<compile_context>
chip_gen: v7x
topology: tpu7x:2x2x1
jax: 0.10.0
libtpu: 0.0.40
codegen_flags: <defaults>
</compile_context>

<pallas_src>
import functools

import jax
import jax.numpy as jnp
from jax.experimental import pallas as pl
from jax.experimental.pallas import tpu as pltpu


def _round_up(x, m):
    return (x + m - 1) // m * m


def add_coords(x):
    """x: (B, C, H, W) -> (B, C+2, H, W); used only for the reference check."""
    b, c, h, w = x.shape
    ch = jnp.broadcast_to(jnp.linspace(-1.0, 1.0, h, dtype=x.dtype)[:, None], (b, 1, h, w))
    cw = jnp.broadcast_to(jnp.linspace(-1.0, 1.0, w, dtype=x.dtype), (b, 1, h, w))
    return jnp.concatenate([x, ch, cw], axis=1)


def _coord_conv_kernel(x_ref, w_ref, pb_ref, o_ref, patches_ref, *, K, Wp, C_pad, n_cols):
    """One batch element per grid step.

    x_ref:       (C_pad, L)              zero-padded image, flattened rows of width Wp (bf16)
    w_ref:       (C_out_pad, K*K*C_pad)  fused per-tap weight matrix (bf16)
    pb_ref:      (C_out_pad, N_pad)      f32 conv bias + coordinate-channel contribution
    o_ref:       (C_out_pad, N_pad)      f32 output; junk columns dropped outside
    patches_ref: (K*K*C_pad, N_pad)      VMEM scratch holding all conv taps (bf16)
    """
    # Fused im2col: K*K static contiguous lane-slices of the resident image, written once
    # into the patches scratch (the only place the misaligned tap shifts are paid).
    for kh in range(K):
        for kw in range(K):
            t = kh * K + kw
            start = kh * Wp + kw                      # static lane offset of this tap
            patches_ref[t * C_pad:(t + 1) * C_pad, :] = x_ref[:, start:start + n_cols]

    # Single MXU matmul, contraction over C_pad*K*K, f32 accumulation.
    acc = jnp.dot(w_ref[...], patches_ref[...], preferred_element_type=jnp.float32)
    o_ref[...] = (acc + pb_ref[...]).astype(o_ref.dtype)


@functools.partial(jax.jit,
                   static_argnames=("kernel_size", "stride", "padding", "compute_dtype"))
def coord_conv2d(x, weight, bias, *, kernel_size, stride=1, padding=0,
                 compute_dtype=jnp.bfloat16):
    """
    x:      (B, C, H, W)        float32
    weight: (C_out, C+2, K, K)  float32 (PyTorch OIHW; last two input channels are coords)
    bias:   (C_out,)            float32
    returns (B, C_out, H_out, W_out) NCHW, matching nn.Conv2d(add_coords(x)).
    """
    B, C, H, W = x.shape
    C_out = weight.shape[0]
    K, p, s = kernel_size, padding, stride

    Hp, Wp = H + 2 * p, W + 2 * p
    H1, W1 = Hp - K + 1, Wp - K + 1          # stride-1 output extents
    N = H1 * Wp                              # flattened output columns (incl. junk cols)
    N_pad = _round_up(N, 128)                # lane-dense accumulator / output stores
    C_pad = _round_up(C, 8)                  # sublane-dense input channels
    C_out_pad = _round_up(C_out, 8)          # sublane-dense output channels
    CKK = K * K * C_pad                      # fused contraction dim

    # Flattened input length covering every tap slice of width N_pad.
    L_need = (K - 1) * Wp + (K - 1) + N_pad
    Hrows = pl.cdiv(L_need, Wp)              # rows of the padded+extended image
    L = Hrows * Wp

    # Single fused cast+pad pass: (B,C,H,W) f32 -> (B,C_pad,Hrows,Wp) bf16 -> free reshape.
    # The extra bottom rows are only ever read into junk output columns.
    # TODO(synk): fold this zero-pad into the kernel (strided DMA of the unpadded image
    # into a pre-zeroed VMEM scratch) to remove this extra HBM pass over the input.
    x_c = x.astype(compute_dtype)
    x_pad = jnp.pad(x_c, ((0, 0), (0, C_pad - C), (p, Hrows - H - p), (p, p)))
    x_flat = x_pad.reshape(B, C_pad, L)

    # Fused weight matrix for the real input channels: (C_out_pad, K*K*C_pad) with
    # contraction index = (kh*K + kw)*C_pad + c, matching the patches scratch layout.
    w_main = jnp.transpose(weight[:, :C, :, :], (0, 2, 3, 1))                 # (O,K,K,C)
    w_main = jnp.pad(w_main, ((0, C_out_pad - C_out), (0, 0), (0, 0), (0, C_pad - C)))
    w_main = w_main.reshape(C_out_pad, CKK).astype(compute_dtype)

    # Positional bias: conv bias + contribution of the two coordinate channels.
    # Batch independent and tiny, so it is precomputed once in f32 at HIGHEST precision.
    ch = jnp.broadcast_to(jnp.linspace(-1.0, 1.0, H, dtype=jnp.float32)[:, None], (H, W))
    cw = jnp.broadcast_to(jnp.linspace(-1.0, 1.0, W, dtype=jnp.float32)[None, :], (H, W))
    coords = jnp.pad(jnp.stack([ch, cw], axis=0), ((0, 0), (p, Hrows - H - p), (p, p)))
    coords_flat = coords.reshape(2, L)
    coord_taps = jnp.stack(
        [coords_flat[:, kh * Wp + kw: kh * Wp + kw + N_pad]
         for kh in range(K) for kw in range(K)],
        axis=1,
    ).reshape(2 * K * K, N_pad)
    w_coord = weight[:, C:, :, :].reshape(C_out, 2 * K * K).astype(jnp.float32)
    pos_bias = bias.astype(jnp.float32)[:, None] + jnp.einsum(
        "ok,kn->on", w_coord, coord_taps, precision=jax.lax.Precision.HIGHEST)
    pos_bias = jnp.pad(pos_bias, ((0, C_out_pad - C_out), (0, 0)))

    # Generation-aware VMEM budget (double-buffered image/output blocks + residents).
    itemsize = jnp.dtype(compute_dtype).itemsize
    block_bytes = (2 * C_pad * L * itemsize            # image block (double-buffered)
                   + 2 * C_out_pad * N_pad * 4         # output block (double-buffered)
                   + 2 * C_out_pad * N_pad * 4         # positional bias
                   + 2 * C_out_pad * CKK * itemsize    # fused weights
                   + CKK * N_pad * itemsize)           # patches scratch
    try:
        vmem_cap = pltpu.get_tpu_info().vmem_capacity_bytes
    except Exception:  # conservative fallback: v7x has 64 MiB per TensorCore
        vmem_cap = 64 * 1024 * 1024
    vmem_limit = int(min(max(2 * block_bytes, 16 * 1024 * 1024), vmem_cap * 7 // 8))

    kernel = functools.partial(_coord_conv_kernel, K=K, Wp=Wp, C_pad=C_pad, n_cols=N_pad)
    bytes_accessed = (x_flat.size * itemsize + w_main.size * itemsize
                      + pos_bias.size * 4 + B * C_out_pad * N_pad * 4)

    out_flat = pl.pallas_call(
        kernel,
        out_shape=jax.ShapeDtypeStruct((B, C_out_pad, N_pad), jnp.float32),
        grid=(B,),
        in_specs=[
            pl.BlockSpec((None, C_pad, L), lambda b: (b, 0, 0)),       # one image per step
            pl.BlockSpec((C_out_pad, CKK), lambda b: (0, 0)),          # resident weights
            pl.BlockSpec((C_out_pad, N_pad), lambda b: (0, 0)),        # resident pos. bias
        ],
        out_specs=pl.BlockSpec((None, C_out_pad, N_pad), lambda b: (b, 0, 0)),
        scratch_shapes=[pltpu.VMEM((CKK, N_pad), compute_dtype)],
        compiler_params=pltpu.CompilerParams(
            dimension_semantics=("parallel",),
            vmem_limit_bytes=vmem_limit,
        ),
        cost_estimate=pl.CostEstimate(
            flops=2 * B * C_out * C * K * K * N,
            transcendentals=0,
            bytes_accessed=bytes_accessed,
        ),
    )(x_flat, w_main, pos_bias)

    # Already NCHW-ordered in flattened rows; drop channel/lane padding and junk columns.
    # TODO(synk): consumers that can read the padded (B, C_out_pad, N_pad) layout directly
    # avoid this small extra HBM pass over the output.
    out = out_flat[:, :C_out, :N].reshape(B, C_out, H1, Wp)[:, :, :, :W1]
    if s != 1:
        # TODO(synk): dedicated strided kernel (strided lane gather while building the
        # patches); for now compute the stride-1 map and subsample.
        out = out[:, :, ::s, ::s]
    return out


if __name__ == "__main__":
    # Small deterministic example: B=2, C=4, H=W=16, C_out=8, K=3, stride=1, pad=1
    B, C, H, W = 2, 4, 16, 16
    C_OUT, K, STRIDE, PAD = 8, 3, 1, 1

    key = jax.random.PRNGKey(0)
    kx, kw_, kb = jax.random.split(key, 3)
    x = jax.random.normal(kx, (B, C, H, W), dtype=jnp.float32)
    fan_in = (C + 2) * K * K
    bound = fan_in ** -0.5
    weight = jax.random.uniform(kw_, (C_OUT, C + 2, K, K), jnp.float32, -bound, bound)
    bias = jax.random.uniform(kb, (C_OUT,), jnp.float32, -bound, bound)

    out = coord_conv2d(x, weight, bias, kernel_size=K, stride=STRIDE, padding=PAD)
    out = jax.block_until_ready(out)

    # Reference: same semantics as torch.nn.Conv2d over add_coords(x), in f32.
    ref = jax.lax.conv_general_dilated(
        add_coords(x), weight, window_strides=(STRIDE, STRIDE),
        padding=((PAD, PAD), (PAD, PAD)),
        dimension_numbers=("NCHW", "OIHW", "NCHW"),
        precision=jax.lax.Precision.HIGHEST,
    ) + bias[None, :, None, None]

    assert out.shape == ref.shape, (out.shape, ref.shape)
    max_err = float(jnp.max(jnp.abs(out - ref)))
    # bf16 MXU inputs with f32 accumulation -> tolerance loosened accordingly.
    assert jnp.allclose(out, ref, atol=2e-2, rtol=2e-2), max_err
    print("KERNEL_OK")
</pallas_src>

<mosaic_0001>
module attributes {stable_mosaic.version = 11 : i64} {
  func.func @_coord_conv_kernel(%arg0: i32, %arg1: memref<1x8x432xbf16, #tpu.memory_space<vmem>>, %arg2: memref<8x72xbf16, #tpu.memory_space<vmem>>, %arg3: memref<8x384xf32, #tpu.memory_space<vmem>>, %arg4: memref<1x8x384xf32, #tpu.memory_space<vmem>>, %arg5: memref<72x384xbf16, #tpu.memory_space<vmem>>) attributes {dimension_semantics = [#tpu.dimension_semantics<parallel>], iteration_bounds = array<i64: 2>, scalar_prefetch = 0 : i64, scratch_operands = 1 : i64, tpu.core_type = #tpu.core_type<tc>, window_params = [{transform_indices = @transform_0, window_bounds = array<i64: 1, 8, 432>}, {pipeline_mode = #tpu.pipeline_mode<synchronous>, transform_indices = @transform_1, window_bounds = array<i64: 8, 72>}, {pipeline_mode = #tpu.pipeline_mode<synchronous>, transform_indices = @transform_2, window_bounds = array<i64: 8, 384>}, {transform_indices = @transform_3, window_bounds = array<i64: 1, 8, 384>}]} {
    %c0 = arith.constant 0 : index
    %c0_0 = arith.constant 0 : index
    %c0_1 = arith.constant 0 : index
    %0 = vector.load %arg1[%c0, %c0_0, %c0_1] : memref<1x8x432xbf16, #tpu.memory_space<vmem>>, vector<1x8x384xbf16>
    %1 = vector.shape_cast %0 : vector<1x8x384xbf16> to vector<8x384xbf16>
    %c0_2 = arith.constant 0 : index
    %c0_3 = arith.constant 0 : index
    %2 = vector.load %arg5[%c0_2, %c0_3] : memref<72x384xbf16, #tpu.memory_space<vmem>>, vector<8x384xbf16>
    tpu.vector_store %arg5[%c0_2, %c0_3], %1 {strides = array<i32>} : memref<72x384xbf16, #tpu.memory_space<vmem>>, vector<8x384xbf16>,
    %c0_4 = arith.constant 0 : index
    %c0_5 = arith.constant 0 : index
    %c1 = arith.constant 1 : index
    %3 = vector.load %arg1[%c0_4, %c0_5, %c1] : memref<1x8x432xbf16, #tpu.memory_space<vmem>>, vector<1x8x384xbf16>
    %4 = vector.shape_cast %3 : vector<1x8x384xbf16> to vector<8x384xbf16>
    %c8 = arith.constant 8 : index
    %c0_6 = arith.constant 0 : index
    %5 = vector.load %arg5[%c8, %c0_6] : memref<72x384xbf16, #tpu.memory_space<vmem>>, vector<8x384xbf16>
    tpu.vector_store %arg5[%c8, %c0_6], %4 {strides = array<i32>} : memref<72x384xbf16, #tpu.memory_space<vmem>>, vector<8x384xbf16>,
    %c0_7 = arith.constant 0 : index
    %c0_8 = arith.constant 0 : index
    %c2 = arith.constant 2 : index
    %6 = vector.load %arg1[%c0_7, %c0_8, %c2] : memref<1x8x432xbf16, #tpu.memory_space<vmem>>, vector<1x8x384xbf16>
    %7 = vector.shape_cast %6 : vector<1x8x384xbf16> to vector<8x384xbf16>
    %c16 = arith.constant 16 : index
    %c0_9 = arith.constant 0 : index
    %8 = vector.load %arg5[%c16, %c0_9] : memref<72x384xbf16, #tpu.memory_space<vmem>>, vector<8x384xbf16>
    tpu.vector_store %arg5[%c16, %c0_9], %7 {strides = array<i32>} : memref<72x384xbf16, #tpu.memory_space<vmem>>, vector<8x384xbf16>,
    %c0_10 = arith.constant 0 : index
    %c0_11 = arith.constant 0 : index
    %c18 = arith.constant 18 : index
    %9 = vector.load %arg1[%c0_10, %c0_11, %c18] : memref<1x8x432xbf16, #tpu.memory_space<vmem>>, vector<1x8x384xbf16>
    %10 = vector.shape_cast %9 : vector<1x8x384xbf16> to vector<8x384xbf16>
    %c24 = arith.constant 24 : index
    %c0_12 = arith.constant 0 : index
    %11 = vector.load %arg5[%c24, %c0_12] : memref<72x384xbf16, #tpu.memory_space<vmem>>, vector<8x384xbf16>
    tpu.vector_store %arg5[%c24, %c0_12], %10 {strides = array<i32>} : memref<72x384xbf16, #tpu.memory_space<vmem>>, vector<8x384xbf16>,
    %c0_13 = arith.constant 0 : index
    %c0_14 = arith.constant 0 : index
    %c19 = arith.constant 19 : index
    %12 = vector.load %arg1[%c0_13, %c0_14, %c19] : memref<1x8x432xbf16, #tpu.memory_space<vmem>>, vector<1x8x384xbf16>
    %13 = vector.shape_cast %12 : vector<1x8x384xbf16> to vector<8x384xbf16>
    %c32 = arith.constant 32 : index
    %c0_15 = arith.constant 0 : index
    %14 = vector.load %arg5[%c32, %c0_15] : memref<72x384xbf16, #tpu.memory_space<vmem>>, vector<8x384xbf16>
    tpu.vector_store %arg5[%c32, %c0_15], %13 {strides = array<i32>} : memref<72x384xbf16, #tpu.memory_space<vmem>>, vector<8x384xbf16>,
    %c0_16 = arith.constant 0 : index
    %c0_17 = arith.constant 0 : index
    %c20 = arith.constant 20 : index
    %15 = vector.load %arg1[%c0_16, %c0_17, %c20] : memref<1x8x432xbf16, #tpu.memory_space<vmem>>, vector<1x8x384xbf16>
    %16 = vector.shape_cast %15 : vector<1x8x384xbf16> to vector<8x384xbf16>
    %c40 = arith.constant 40 : index
    %c0_18 = arith.constant 0 : index
    %17 = vector.load %arg5[%c40, %c0_18] : memref<72x384xbf16, #tpu.memory_space<vmem>>, vector<8x384xbf16>
    tpu.vector_store %arg5[%c40, %c0_18], %16 {strides = array<i32>} : memref<72x384xbf16, #tpu.memory_space<vmem>>, vector<8x384xbf16>,
    %c0_19 = arith.constant 0 : index
    %c0_20 = arith.constant 0 : index
    %c36 = arith.constant 36 : index
    %18 = vector.load %arg1[%c0_19, %c0_20, %c36] : memref<1x8x432xbf16, #tpu.memory_space<vmem>>, vector<1x8x384xbf16>
    %19 = vector.shape_cast %18 : vector<1x8x384xbf16> to vector<8x384xbf16>
    %c48 = arith.constant 48 : index
    %c0_21 = arith.constant 0 : index
    %20 = vector.load %arg5[%c48, %c0_21] : memref<72x384xbf16, #tpu.memory_space<vmem>>, vector<8x384xbf16>
    tpu.vector_store %arg5[%c48, %c0_21], %19 {strides = array<i32>} : memref<72x384xbf16, #tpu.memory_space<vmem>>, vector<8x384xbf16>,
    %c0_22 = arith.constant 0 : index
    %c0_23 = arith.constant 0 : index
    %c37 = arith.constant 37 : index
    %21 = vector.load %arg1[%c0_22, %c0_23, %c37] : memref<1x8x432xbf16, #tpu.memory_space<vmem>>, vector<1x8x384xbf16>
    %22 = vector.shape_cast %21 : vector<1x8x384xbf16> to vector<8x384xbf16>
    %c56 = arith.constant 56 : index
    %c0_24 = arith.constant 0 : index
    %23 = vector.load %arg5[%c56, %c0_24] : memref<72x384xbf16, #tpu.memory_space<vmem>>, vector<8x384xbf16>
    tpu.vector_store %arg5[%c56, %c0_24], %22 {strides = array<i32>} : memref<72x384xbf16, #tpu.memory_space<vmem>>, vector<8x384xbf16>,
    %c0_25 = arith.constant 0 : index
    %c0_26 = arith.constant 0 : index
    %c38 = arith.constant 38 : index
    %24 = vector.load %arg1[%c0_25, %c0_26, %c38] : memref<1x8x432xbf16, #tpu.memory_space<vmem>>, vector<1x8x384xbf16>
    %25 = vector.shape_cast %24 : vector<1x8x384xbf16> to vector<8x384xbf16>
    %c64 = arith.constant 64 : index
    %c0_27 = arith.constant 0 : index
    %26 = vector.load %arg5[%c64, %c0_27] : memref<72x384xbf16, #tpu.memory_space<vmem>>, vector<8x384xbf16>
    tpu.vector_store %arg5[%c64, %c0_27], %25 {strides = array<i32>} : memref<72x384xbf16, #tpu.memory_space<vmem>>, vector<8x384xbf16>,
    %c0_28 = arith.constant 0 : index
    %c0_29 = arith.constant 0 : index
    %27 = vector.load %arg2[%c0_28, %c0_29] : memref<8x72xbf16, #tpu.memory_space<vmem>>, vector<8x72xbf16>
    %c0_30 = arith.constant 0 : index
    %c0_31 = arith.constant 0 : index
    %28 = vector.load %arg5[%c0_30, %c0_31] : memref<72x384xbf16, #tpu.memory_space<vmem>>, vector<72x384xbf16>
    %cst = arith.constant dense<0.000000e+00> : vector<8x384xf32>
    %29 = tpu.matmul %27, %28, %cst {dimension_numbers = #tpu.dot_dimension_numbers<[1], [0], [0], [1], [0, 0, 1, 1], [], []>} : vector<8x72xbf16>, vector<72x384xbf16>, vector<8x384xf32> -> vector<8x384xf32>
    %c0_32 = arith.constant 0 : index
    %c0_33 = arith.constant 0 : index
    %30 = vector.load %arg3[%c0_32, %c0_33] : memref<8x384xf32, #tpu.memory_space<vmem>>, vector<8x384xf32>
    %31 = arith.addf %29, %30 : vector<8x384xf32>
    %c0_34 = arith.constant 0 : index
    %c0_35 = arith.constant 0 : index
    %c0_36 = arith.constant 0 : index
    %32 = vector.load %arg4[%c0_34, %c0_35, %c0_36] : memref<1x8x384xf32, #tpu.memory_space<vmem>>, vector<1x8x384xf32>
    %33 = vector.shape_cast %32 : vector<1x8x384xf32> to vector<8x384xf32>
    %34 = vector.shape_cast %31 : vector<8x384xf32> to vector<1x8x384xf32>
    tpu.vector_store %arg4[%c0_34, %c0_35, %c0_36], %34 {strides = array<i32>} : memref<1x8x384xf32, #tpu.memory_space<vmem>>, vector<1x8x384xf32>,
    return
  }
  func.func @transform_0(%arg0: i32) -> (i32, i32, i32) {
    %c0_i32 = arith.constant 0 : i32
    %c0_i32_0 = arith.constant 0 : i32
    %c0_i32_1 = arith.constant 0 : i32
    return %arg0, %c0_i32, %c0_i32_0 : i32, i32, i32
  }
  func.func @transform_1(%arg0: i32) -> (i32, i32) {
    %c0_i32 = arith.constant 0 : i32
    %c0_i32_0 = arith.constant 0 : i32
    %c0_i32_1 = arith.constant 0 : i32
    return %c0_i32, %c0_i32_0 : i32, i32
  }
  func.func @transform_2(%arg0: i32) -> (i32, i32) {
    %c0_i32 = arith.constant 0 : i32
    %c0_i32_0 = arith.constant 0 : i32
    %c0_i32_1 = arith.constant 0 : i32
    return %c0_i32, %c0_i32_0 : i32, i32
  }
  func.func @transform_3(%arg0: i32) -> (i32, i32, i32) {
    %c0_i32 = arith.constant 0 : i32
    %c0_i32_0 = arith.constant 0 : i32
    %c0_i32_1 = arith.constant 0 : i32
    return %arg0, %c0_i32, %c0_i32_0 : i32, i32, i32
  }
}

</mosaic_0001>

<bundles_post_ra>
// kernel: coord_conv2d.1
= control target key start
LH: loop header
LB: loop body
LE: loop exit
PB: predicated region body
PF: predicated region fallthrough
CT: control target
= control target key end

     0   :  { %s681_s12 = smov 0   ;;  %s743_s0 = inlined_call_operand.vmem [shape: bf16[2,8,432], index: 0, kind: input, shape index: {}]   ;;  %s744_s1 = inlined_call_operand.vmem [shape: bf16[8,72], index: 1, kind: input, shape index: {}]   ;;  %s745_s2 = inlined_call_operand.vmem [shape: f32[8,384], index: 2, kind: input, shape index: {}]   ;;  %s746_s3 = inlined_call_operand.vmem [shape: f32[2,8,384], index: 3, kind: output, shape index: {}]  }
   0x1 LB: > { %s568_s13 = sadd.s32 4294967295, %s648_s12   ;;  %p572_p0 = scmp.ge.s32.totalorder %s648_s12, 1  ;;  %s648_s12 = sphi %s681_s12, %s13_s12  }
   0x2   : > { %p137_p1 = scmp.lt.s32.totalorder %s648_s12, 3 }
   0x4   : > { %p138_p2 = pnand %p572_p0, %p137_p1 }
   0x5   : > { %p161_p3 = scmp.lt.s32.totalorder (!%p138_p2), %s568_s13, 1  ;;  %s650_s18 = smov (!%p138_p2), 126   ;;  %v652_v3 = vmov (!%p138_p2), 0.0   ;;  %v658_v4 = vmov (!%p138_p2), 0   ;;  %vm660_vm0 = vmmov (!%p138_p2), 0   ;;  %vm186_vm1 = vcmask (!%p138_p2), 1043456  }
   0x6   : > { %141 = sbr.rel (%p138_p2) target bundleno = 390 (0x186), region = 32  ;;  %s651_s19 = smov (!%p138_p2), 127   ;;  %603 = vmatprep.subr.bf16.mxu1 (!%p138_p2), %v652_v3  ;;  %461 = vmatprep.mubr.bf16.mxu0 (!%p138_p2), %v658_v4  ;;  %vm206_vm2 = vcmask (!%p138_p2), 1031168   ;;  %vm188_vm3 = vcmask (!%p138_p2), 1039360   ;;  %vm224_vm4 = vcmask (!%p138_p2), 900096   ;;  %vm242_vm5 = vcmask (!%p138_p2), 891904  }
   0x7   : > { %s653_s20 = smov (!%p138_p2), 110   ;;  %s654_s21 = smov (!%p138_p2), 109   ;;  %613 = vmatprep.mubr.msk.bf16.mxu1 (!%p138_p2), %vm660_vm0, %v652_v3  ;;  %vm260_vm6 = vcmask (!%p138_p2), 883712   ;;  %vm278_vm7 = vcmask (!%p138_p2), 752640   ;;  %vm296_vm8 = vcmask (!%p138_p2), 744448   ;;  %vm314_vm9 = vcmask (!%p138_p2), 736256  }
   0x8   : > { %s655_s22 = smov (!%p138_p2), 108   ;;  %s656_s23 = smov (!%p138_p2), 92   ;;  %vm415_vm10 = vcmask (!%p138_p2), 588800  }
   0x9   : > { %s657_s24 = smov (!%p138_p2), 91   ;;  %s659_s25 = smov (!%p138_p2), 90  }
   0xd   : > { %s748_s13 = smov (!%p161_p3, %s568_s13), 1 }
   0xe   : > { %s596_s14 = sshll.u32 %s748_s13, 4  ;;  %s617_s28 = smul.u32 24, %s748_s13 }
   0xf   : > { %s165_s17 = scalar_lea.vmem %s743_s0, %s596_s14 }
  0x10   : > { %v695_v0 = vld [vmem:[%s165_s17] sm:$0xff]  ;;  %v173_v1 = vld [vmem:[%s165_s17 + $0x8] sm:$0xf]  ;;  %s170_s8 = scalar_lea.vmem %s746_s3, %s617_s28 }
  0x11   : > { %199 = vrot.lane.b32.xlu1 %v695_v0, %s650_s18  ;;  %180 = vrot.lane.b32.xlu0 %v695_v0, %s651_s19  ;;  %175 = vst [vmem:[#allocation2 + $0x8] sm:$0xf] %v173_v1  ;;  %v196_v2 = vld [vmem:[%s165_s17 + $0x8] sm:$0xff] }
  0x15   : > { %201 = vrot.lane.b32.xlu1 %v196_v2, %s650_s18  ;;  %182 = vrot.lane.b32.xlu0 %v196_v2, %s651_s19 }
  0x19   : > { %219 = vrot.lane.b32.xlu1 %v196_v2, %s653_s20  ;;  %217 = vrot.lane.b32.xlu0 %v695_v0, %s653_s20 }
  0x1d   : > { %237 = vrot.lane.b32.xlu1 %v196_v2, %s654_s21  ;;  %235 = vrot.lane.b32.xlu0 %v695_v0, %s654_s21 }
  0x21   : > { %255 = vrot.lane.b32.xlu1 %v196_v2, %s655_s22  ;;  %253 = vrot.lane.b32.xlu0 %v695_v0, %s655_s22 }
  0x25   : > { %273 = vrot.lane.b32.xlu1 %v196_v2, %s656_s23  ;;  %271 = vrot.lane.b32.xlu0 %v695_v0, %s656_s23 }
  0x29   : > { %291 = vrot.lane.b32.xlu1 %v196_v2, %s657_s24  ;;  %289 = vrot.lane.b32.xlu0 %v695_v0, %s657_s24 }
  0x2d   : > { %309 = vrot.lane.b32.xlu1 %v196_v2, %s659_s25  ;;  %307 = vrot.lane.b32.xlu0 %v695_v0, %s659_s25 }
  0x83   : > { %v200_v5 = vpop.permute.xlu1 %199  ;;  %v181_v6 = vpop.permute.xlu0 %180 }
  0x84   : > { %v184_v7 = vrot.slane %v181_v6, 4  ;;  %v203_v10 = vrot.slane %v200_v5, 4 }
  0x87   : > { %v202_v8 = vpop.permute.xlu1 %201  ;;  %v183_v9 = vpop.permute.xlu0 %182 }
  0x88   : > { %v204_v11 = vrot.slane %v202_v8, 4  ;;  %v185_v12 = vrot.slane %v183_v9, 4 }
  0x8a   : > { %v205_v13 = vsel %vm186_vm1, %v203_v10, %v204_v11  ;;  %v208_v14 = vsel %vm206_vm2, %v202_v8, %v204_v11  ;;  %v187_v15 = vsel %vm186_vm1, %v184_v7, %v185_v12  ;;  %v190_v16 = vsel %vm188_vm3, %v183_v9, %v185_v12 }
  0x8b   : > { %v207_v17 = vsel %vm206_vm2, %v200_v5, %v205_v13  ;;  %212 = vst [vmem:[#allocation2 + $0x20] sm:$0xf] %v208_v14  ;;  %v189_v18 = vsel %vm188_vm3, %v181_v6, %v187_v15  ;;  %194 = vst [vmem:[#allocation2 + $0x14] sm:$0xf] %v190_v16  ;;  %v220_v19 = vpop.permute.xlu1 %219  ;;  %v218_v20 = vpop.permute.xlu0 %217  ;;  %v321_v13 = vld [vmem:[%s744_s1] sm:$0xf] }
  0x8c   : > { %v222_v21 = vrot.slane %v220_v19, 4  ;;  %v221_v22 = vrot.slane %v218_v20, 4  ;;  %v577_v23 = vcombine.high %v695_v0, %v189_v18  ;;  %v576_v24 = vcombine.low %v695_v0, %v189_v18  ;;  %v340_v16 = vld [vmem:[%s745_s2] sm:$0xff] }
  0x8e   : > { %v226_v25 = vsel %vm224_vm4, %v220_v19, %v222_v21  ;;  %v223_v26 = vsel %vm186_vm1, %v221_v22, %v222_v21  ;;  %429 = vmatprep.subr.bf16.mxu0 %v577_v23  ;;  %v342_v23 = vld [vmem:[%s745_s2 + $0x10] sm:$0xff] }
  0x8f   : > { %230 = vst [vmem:[#allocation2 + $0x2c] sm:$0xf] %v226_v25  ;;  %v225_v27 = vsel %vm224_vm4, %v218_v20, %v223_v26  ;;  %v238_v28 = vpop.permute.xlu1 %237  ;;  %v236_v29 = vpop.permute.xlu0 %235  ;;  %430 = vmatpush1.bf16.msra.mxu0 %v576_v24 }
  0x90   : > { %v240_v30 = vrot.slane %v238_v28, 4  ;;  %v239_v31 = vrot.slane %v236_v29, 4  ;;  %v580_v32 = vcombine.high %v207_v17, %v225_v27  ;;  %v579_v33 = vcombine.low %v207_v17, %v225_v27  ;;  %v341_v17 = vld [vmem:[%s745_s2 + $0x8] sm:$0xff] }
  0x92   : > { %v244_v34 = vsel %vm242_vm5, %v238_v28, %v240_v30  ;;  %v241_v35 = vsel %vm186_vm1, %v239_v31, %v240_v30  ;;  %v637_v36 = vld [vmem:[#allocation2 + $0x8] ss:$12 sps:$4 sm:$0xff]   ;;  %431 = vmatprep.subr.bf16.mxu0 %v580_v32 }
  0x93   : > { %248 = vst [vmem:[#allocation2 + $0x38] sm:$0xf] %v244_v34  ;;  %v243_v37 = vsel %vm242_vm5, %v236_v29, %v241_v35  ;;  %v256_v38 = vpop.permute.xlu1 %255  ;;  %v254_v39 = vpop.permute.xlu0 %253  ;;  %432 = vmatpush1.bf16.msra.mxu0 %v579_v33  ;;  %604 = vmatpush3.bf16.msra.mxu1 %v637_v36 }
  0x94   : > { %v258_v40 = vrot.slane %v256_v38, 4  ;;  %v257_v41 = vrot.slane %v254_v39, 4  ;;  %605 = vmatprep.subr.bf16.mxu1 %v652_v3 }
  0x96   : > { %v262_v42 = vsel %vm260_vm6, %v256_v38, %v258_v40  ;;  %v259_v43 = vsel %vm186_vm1, %v257_v41, %v258_v40  ;;  %v638_v44 = vld [vmem:[#allocation2 + $0x20] ss:$12 sps:$4 sm:$0xff]  }
  0x97   : > { %266 = vst [vmem:[#allocation2 + $0x44] sm:$0xf] %v262_v42  ;;  %v261_v45 = vsel %vm260_vm6, %v254_v39, %v259_v43  ;;  %v274_v46 = vpop.permute.xlu1 %273  ;;  %v272_v47 = vpop.permute.xlu0 %271  ;;  %606 = vmatpush3.bf16.msra.mxu1 %v638_v44 }
  0x98   : > { %v276_v48 = vrot.slane %v274_v46, 4  ;;  %v275_v49 = vrot.slane %v272_v47, 4  ;;  %v583_v50 = vcombine.high %v243_v37, %v261_v45  ;;  %v582_v51 = vcombine.low %v243_v37, %v261_v45  ;;  %607 = vmatprep.subr.bf16.mxu1 %v652_v3 }
  0x9a   : > { %v280_v52 = vsel %vm278_vm7, %v274_v46, %v276_v48  ;;  %v277_v53 = vsel %vm186_vm1, %v275_v49, %v276_v48  ;;  %433 = vmatprep.subr.bf16.mxu0 %v583_v50 }
  0x9b   : > { %284 = vst [vmem:[#allocation2 + $0x50] sm:$0xf] %v280_v52  ;;  %v279_v54 = vsel %vm278_vm7, %v272_v47, %v277_v53  ;;  %v292_v55 = vpop.permute.xlu1 %291  ;;  %v290_v56 = vpop.permute.xlu0 %289  ;;  %434 = vmatpush1.bf16.msra.mxu0 %v582_v51 }
  0x9c   : > { %v294_v57 = vrot.slane %v292_v55, 4  ;;  %v293_v58 = vrot.slane %v290_v56, 4 }
  0x9e   : > { %v298_v59 = vsel %vm296_vm8, %v292_v55, %v294_v57  ;;  %v295_v60 = vsel %vm186_vm1, %v293_v58, %v294_v57  ;;  %v639_v61 = vld [vmem:[#allocation2 + $0x38] ss:$12 sps:$4 sm:$0xff]  }
  0x9f   : > { %302 = vst [vmem:[#allocation2 + $0x5c] sm:$0xf] %v298_v59  ;;  %v297_v62 = vsel %vm296_vm8, %v290_v56, %v295_v60  ;;  %v310_v63 = vpop.permute.xlu1 %309  ;;  %v308_v0 = vpop.permute.xlu0 %307  ;;  %608 = vmatpush3.bf16.msra.mxu1 %v639_v61 }
  0xa0   : > { %v312_v1 = vrot.slane %v310_v63, 4  ;;  %v311_v2 = vrot.slane %v308_v0, 4  ;;  %v586_v4 = vcombine.high %v279_v54, %v297_v62  ;;  %v585_v5 = vcombine.low %v279_v54, %v297_v62  ;;  %609 = vmatprep.subr.bf16.mxu1 %v652_v3 }
  0xa2   : > { %v316_v6 = vsel %vm314_vm9, %v310_v63, %v312_v1  ;;  %v313_v7 = vsel %vm186_vm1, %v311_v2, %v312_v1  ;;  %435 = vmatprep.subr.bf16.mxu0 %v586_v4 }
  0xa3   : > { %320 = vst [vmem:[#allocation2 + $0x68] sm:$0xf] %v316_v6  ;;  %v315_v8 = vsel %vm314_vm9, %v308_v0, %v313_v7  ;;  %436 = vmatpush1.bf16.msra.mxu0 %v585_v5 }
  0xa4   : > { %v589_v9 = vcombine.high %v315_v8, %v315_v8  ;;  %v588_v10 = vcombine.low %v315_v8, %v315_v8 }
  0xa6   : > { %v640_v11 = vld [vmem:[#allocation2 + $0x50] ss:$12 sps:$4 sm:$0xff]   ;;  %591 = vmatprep.subr.msk.bf16.mxu0 %vm186_vm1, %v589_v9  ;;  %v421_v12 = vsel %vm186_vm1, %v588_v10, 0 }
  0xa7   : > { %438 = vmatpush1.bf16.msra.mxu0 %v421_v12  ;;  %610 = vmatpush3.bf16.msra.mxu1 %v640_v11 }
  0xa8   : > { %611 = vmatprep.subr.bf16.mxu1 %v652_v3 }
  0xaa   : > { %v641_v14 = vld [vmem:[#allocation2 + $0x68] ss:$0 sps:$4 sm:$0xff]   ;;  %592 = vmatmul.mubr.msk.bf16.vlgmr.msra.gmra.mrb[0].mxu0 %vm415_vm10, %v321_v13 }
  0xab   : > { %v427_v15 = vsel %vm186_vm1, %v641_v14, 0 }
  0xac   : > { %612 = vmatpush3.bf16.msra.mxu1 %v427_v15 }
  0xaf   : > { %614 = vmatmul.mubr.msk.bf16.vlgmr.msra.gmra.mrb[0].mxu1 %vm415_vm10, %v321_v13 }
 0x17d   : > { %v463_v3 = vpop.f32.mrb[0].mxu0 }
 0x17e   : > { %v464_v18 = vadd.f32 %v463_v3, %v340_v16  ;;  %v465_v19 = vpop.f32.mrb[1].mxu0 }
 0x17f   : > { %v466_v20 = vadd.f32 %v465_v19, %v341_v17  ;;  %v467_v21 = vpop.f32.mrb[2].mxu0 }
 0x180   : > { %510 = vst [vmem:[%s170_s8] sm:$0xff] %v464_v18  ;;  %v468_v22 = vpop.f32.mrb[3].mxu0 }
 0x181   : > { %511 = vst [vmem:[%s170_s8 + $0x8] sm:$0xff] %v466_v20 }
 0x182   : > { %v504_v24 = vpop.f32.mrb[0].mxu1 }
 0x183   : > { %v505_v25 = vadd.f32 %v504_v24, %v342_v23  ;;  %v615_v26 = vpop.f32.mrb[1].mxu1 }
 0x184   : > { %v507_v27 = vpop.f32.mrb[2].mxu1 }
 0x185   : > { %512 = vst [vmem:[%s170_s8 + $0x10] sm:$0xff] %v505_v25  ;;  %v616_v28 = vpop.f32.mrb[3].mxu1 }
 0x186 PF: > { %s13_s12 = sadd.s32 1, %s648_s12  }
 0x187   : > { %p10_p4 = scmp.ge.s32.totalorder %s13_s12, 4  }
 0x189   :  { %12 = sbr.rel (!%p10_p4) target bundleno = 1 (0x1), region = 62 }

</bundles_post_ra>
